<compile_context>
chip_gen: v6e
topology: v6e:2x2x1
jax: 0.10.0
libtpu: 0.0.40
codegen_flags: <defaults>
</compile_context>

<pallas_src>
import math
import jax
import jax.numpy as jnp
from jax.experimental import pallas as pl
from jax.experimental.pallas import tpu as pltpu


def gcn_kernel(adj_ref, const_ref, deg_ref, w_ref, b_sum_ref, out_ref):
    # adj_ref   (tn, n_rel, E) bf16 : node relation embeddings for one (b, r) tile
    # const_ref (1, H)         f32  : n_rel * (b_adj@Wa^T + q@Wq^T + b_gcn) @ Ws^T (per b,r)
    # deg_ref   (tn, 1)        f32  : deg^-2 (0 where deg == 0), precomputed
    # w_ref     (E, H)         bf16 : folded (w_sum @ wg_a @ w_adj)^T, pre-transposed
    # b_sum_ref (1, H)         f32
    # out_ref   (tn, H)        f32
    adj_sum = adj_ref[...].sum(axis=1)                       # relation sum BEFORE matmul (n_rel x fewer FLOPs)
    x = jnp.dot(adj_sum, w_ref[...],
                preferred_element_type=jnp.float32)          # single MXU matmul (bf16 in, f32 acc)
    node = deg_ref[...] * (x + const_ref[...]) + b_sum_ref[...]
    m = jnp.max(node, axis=-1, keepdims=True)
    ex = jnp.exp(node - m)
    inv = pl.reciprocal(jnp.sum(ex, axis=-1, keepdims=True), approx=True)  # EUP slot
    out_ref[...] = ex * inv


def _pick_node_tile(n_nodes, max_tile=512):
    # Largest tile <= max_tile that divides n_nodes and is sublane-aligned
    # (multiple of 8) or equal to the full node dim.
    for t in range(min(n_nodes, max_tile), 0, -1):
        if n_nodes % t == 0 and (t % 8 == 0 or t == n_nodes):
            return t
    return n_nodes


def graph_convolution(question, adj_list, node_degrees, params, *, max_node_tile=512):
    b, r, n_nodes, n_rel, e = adj_list.shape
    h = question.shape[-1]
    br = b * r

    w_adj, b_adj, w_gcn, b_gcn, w_sum, b_sum = params
    wg_a = w_gcn[:, :e]        # (H, E) half multiplying adj_proj
    wg_q = w_gcn[:, e:]        # (H, H) half multiplying question

    # --- host-side precompute (tiny; removes 2 of 3 matmuls + all transposes from the kernel)
    w_folded = (w_sum @ wg_a @ w_adj).T.astype(jnp.bfloat16)              # (E, H)

    q_flat = question.reshape(br, h).astype(jnp.float32)
    const = (n_rel * (b_adj @ wg_a.T + q_flat @ wg_q.T + b_gcn)) @ w_sum.T  # (br, H)
    const = const.reshape(br, 1, h).astype(jnp.float32)

    deg = node_degrees.astype(jnp.float32).reshape(br, n_nodes, 1)
    deg_inv = jnp.where(deg != 0.0, 1.0 / (deg * deg), 0.0)               # deg ** -2, zeros stay zero

    adj_f = adj_list.reshape(br, n_nodes, n_rel, e).astype(jnp.bfloat16)

    tn = _pick_node_tile(n_nodes, max_node_tile)
    grid = (br, n_nodes // tn)

    out = pl.pallas_call(
        gcn_kernel,
        out_shape=jax.ShapeDtypeStruct((br, n_nodes, h), jnp.float32),
        grid=grid,
        in_specs=[
            pl.BlockSpec((None, tn, n_rel, e), lambda i, j: (i, j, 0, 0)),  # adj
            pl.BlockSpec((None, 1, h),         lambda i, j: (i, 0, 0)),     # per-(b,r) const row
            pl.BlockSpec((None, tn, 1),        lambda i, j: (i, j, 0)),     # deg^-2
            pl.BlockSpec((e, h),               lambda i, j: (0, 0)),        # folded weight
            pl.BlockSpec((1, h),               lambda i, j: (0, 0)),        # b_sum
        ],
        out_specs=pl.BlockSpec((None, tn, h), lambda i, j: (i, j, 0)),
        compiler_params=pltpu.CompilerParams(
            dimension_semantics=("parallel", "parallel")),
    )(adj_f, const, deg_inv, w_folded, b_sum.reshape(1, h).astype(jnp.float32))

    return out.reshape(b, r, n_nodes, h)


def reference(question, adj_list, node_degrees, params):
    """Plain-JAX mirror of the PyTorch forward, for verification."""
    w_adj, b_adj, w_gcn, b_gcn, w_sum, b_sum = params
    b, r, n, n_rel, e = adj_list.shape
    h = question.shape[-1]
    deg = node_degrees.astype(jnp.float32)
    deg = jnp.where(deg != 0, jnp.power(deg, -2.0), deg)
    deg_inv = deg[..., None]
    a = adj_list @ w_adj.T + b_adj
    q = jnp.broadcast_to(question[:, :, None, None, :], (b, r, n, n_rel, h))
    g = jnp.concatenate([a, q], axis=-1) @ w_gcn.T + b_gcn
    node = (deg_inv * g.sum(axis=-2)) @ w_sum.T + b_sum
    return jax.nn.softmax(node, axis=-1)


def init_linear(key, out_dim, in_dim):
    # PyTorch nn.Linear default init: uniform(-1/sqrt(in), 1/sqrt(in))
    bound = 1.0 / math.sqrt(in_dim)
    kw, kb = jax.random.split(key)
    w = jax.random.uniform(kw, (out_dim, in_dim), jnp.float32, -bound, bound)
    b = jax.random.uniform(kb, (out_dim,), jnp.float32, -bound, bound)
    return w, b


if __name__ == "__main__":
    # Small shapes consistent with the module:
    BATCH, ROUNDS, N_NODES, MAX_REL = 2, 2, 8, 4
    NODE_EMB = 32        # config[ext_knowledge_emb + '_embedding_size']
    LSTM_HIDDEN = 32     # config['lstm_hidden_size']

    key = jax.random.PRNGKey(0)
    k_adj, k_q, k_deg, k_w1, k_w2, k_w3 = jax.random.split(key, 6)

    adj_list = jax.random.normal(
        k_adj, (BATCH, ROUNDS, N_NODES, MAX_REL, NODE_EMB), jnp.float32)
    question = jax.random.normal(k_q, (BATCH, ROUNDS, LSTM_HIDDEN), jnp.float32)
    node_degrees = jax.random.randint(
        k_deg, (BATCH, ROUNDS, N_NODES), 0, 6).astype(jnp.float32)

    w_adj, b_adj = init_linear(k_w1, NODE_EMB, NODE_EMB)
    w_gcn, b_gcn = init_linear(k_w2, LSTM_HIDDEN, NODE_EMB + LSTM_HIDDEN)
    w_sum, b_sum = init_linear(k_w3, LSTM_HIDDEN, LSTM_HIDDEN)
    params = (w_adj, b_adj, w_gcn, b_gcn, w_sum, b_sum)

    out = graph_convolution(question, adj_list, node_degrees, params)
    out = jax.block_until_ready(out)

    ref = jax.block_until_ready(reference(question, adj_list, node_degrees, params))
    assert out.shape == (BATCH, ROUNDS, N_NODES, LSTM_HIDDEN)
    # bf16 MXU operands + approx softmax reciprocal -> slightly looser tolerance than pure f32
    assert jnp.allclose(out, ref, atol=1e-2, rtol=1e-2), "mismatch vs reference"

    print("KERNEL_OK")
</pallas_src>

<mosaic_0001>
module attributes {stable_mosaic.version = 11 : i64} {
  func.func @gcn_kernel(%arg0: i32, %arg1: i32, %arg2: memref<1x8x4x32xbf16, #tpu.memory_space<vmem>>, %arg3: memref<1x1x32xf32, #tpu.memory_space<vmem>>, %arg4: memref<1x8x1xf32, #tpu.memory_space<vmem>>, %arg5: memref<32x32xbf16, #tpu.memory_space<vmem>>, %arg6: memref<1x32xf32, #tpu.memory_space<vmem>>, %arg7: memref<1x8x32xf32, #tpu.memory_space<vmem>>) attributes {dimension_semantics = [#tpu.dimension_semantics<parallel>, #tpu.dimension_semantics<parallel>], iteration_bounds = array<i64: 4, 1>, scalar_prefetch = 0 : i64, scratch_operands = 0 : i64, tpu.core_type = #tpu.core_type<tc>, window_params = [{transform_indices = @transform_0, window_bounds = array<i64: 1, 8, 4, 32>}, {transform_indices = @transform_1, window_bounds = array<i64: 1, 1, 32>}, {transform_indices = @transform_2, window_bounds = array<i64: 1, 8, 1>}, {pipeline_mode = #tpu.pipeline_mode<synchronous>, transform_indices = @transform_3, window_bounds = array<i64: 32, 32>}, {pipeline_mode = #tpu.pipeline_mode<synchronous>, transform_indices = @transform_4, window_bounds = array<i64: 1, 32>}, {transform_indices = @transform_5, window_bounds = array<i64: 1, 8, 32>}]} {
    %c0 = arith.constant 0 : index
    %c0_0 = arith.constant 0 : index
    %c0_1 = arith.constant 0 : index
    %c0_2 = arith.constant 0 : index
    %0 = vector.load %arg2[%c0, %c0_0, %c0_1, %c0_2] : memref<1x8x4x32xbf16, #tpu.memory_space<vmem>>, vector<1x8x4x32xbf16>
    %1 = vector.shape_cast %0 : vector<1x8x4x32xbf16> to vector<8x4x32xbf16>
    %2 = arith.extf %1 : vector<8x4x32xbf16> to vector<8x4x32xf32>
    %cst = arith.constant dense<0.000000e+00> : vector<8x32xf32>
    %3 = vector.multi_reduction <add>, %2, %cst [1] : vector<8x4x32xf32> to vector<8x32xf32>
    %4 = arith.truncf %3 : vector<8x32xf32> to vector<8x32xbf16>
    %c0_3 = arith.constant 0 : index
    %c0_4 = arith.constant 0 : index
    %5 = vector.load %arg5[%c0_3, %c0_4] : memref<32x32xbf16, #tpu.memory_space<vmem>>, vector<32x32xbf16>
    %cst_5 = arith.constant dense<0.000000e+00> : vector<8x32xf32>
    %6 = tpu.matmul %4, %5, %cst_5 {dimension_numbers = #tpu.dot_dimension_numbers<[1], [0], [0], [1], [0, 0, 1, 1], [], []>} : vector<8x32xbf16>, vector<32x32xbf16>, vector<8x32xf32> -> vector<8x32xf32>
    %c0_6 = arith.constant 0 : index
    %c0_7 = arith.constant 0 : index
    %c0_8 = arith.constant 0 : index
    %7 = vector.load %arg4[%c0_6, %c0_7, %c0_8] : memref<1x8x1xf32, #tpu.memory_space<vmem>>, vector<1x8x1xf32>
    %8 = vector.shape_cast %7 : vector<1x8x1xf32> to vector<8x1xf32>
    %c0_9 = arith.constant 0 : index
    %c0_10 = arith.constant 0 : index
    %c0_11 = arith.constant 0 : index
    %9 = vector.load %arg3[%c0_9, %c0_10, %c0_11] : memref<1x1x32xf32, #tpu.memory_space<vmem>>, vector<1x1x32xf32>
    %10 = vector.shape_cast %9 : vector<1x1x32xf32> to vector<1x32xf32>
    %11 = vector.broadcast %10 : vector<1x32xf32> to vector<8x32xf32>
    %12 = arith.addf %6, %11 : vector<8x32xf32>
    %13 = vector.broadcast %8 : vector<8x1xf32> to vector<8x32xf32>
    %14 = arith.mulf %13, %12 : vector<8x32xf32>
    %c0_12 = arith.constant 0 : index
    %c0_13 = arith.constant 0 : index
    %15 = vector.load %arg6[%c0_12, %c0_13] : memref<1x32xf32, #tpu.memory_space<vmem>>, vector<1x32xf32>
    %16 = vector.broadcast %15 : vector<1x32xf32> to vector<8x32xf32>
    %17 = arith.addf %14, %16 : vector<8x32xf32>
    %cst_14 = arith.constant dense<0xFF800000> : vector<8xf32>
    %18 = vector.multi_reduction <maximumf>, %17, %cst_14 [1] : vector<8x32xf32> to vector<8xf32>
    %19 = vector.shape_cast %18 : vector<8xf32> to vector<8x1xf32>
    %20 = vector.broadcast %19 : vector<8x1xf32> to vector<8x32xf32>
    %21 = arith.subf %17, %20 : vector<8x32xf32>
    %22 = math.exp %21 : vector<8x32xf32>
    %cst_15 = arith.constant dense<0.000000e+00> : vector<8xf32>
    %23 = vector.multi_reduction <add>, %22, %cst_15 [1] : vector<8x32xf32> to vector<8xf32>
    %24 = vector.shape_cast %23 : vector<8xf32> to vector<8x1xf32>
    %25 = tpu.reciprocal %24 {approx = true} : vector<8x1xf32> -> vector<8x1xf32>
    %26 = vector.broadcast %25 : vector<8x1xf32> to vector<8x32xf32>
    %27 = arith.mulf %22, %26 : vector<8x32xf32>
    %c0_16 = arith.constant 0 : index
    %c0_17 = arith.constant 0 : index
    %c0_18 = arith.constant 0 : index
    %28 = vector.load %arg7[%c0_16, %c0_17, %c0_18] : memref<1x8x32xf32, #tpu.memory_space<vmem>>, vector<1x8x32xf32>
    %29 = vector.shape_cast %28 : vector<1x8x32xf32> to vector<8x32xf32>
    %30 = vector.shape_cast %27 : vector<8x32xf32> to vector<1x8x32xf32>
    tpu.vector_store %arg7[%c0_16, %c0_17, %c0_18], %30 {strides = array<i32>} : memref<1x8x32xf32, #tpu.memory_space<vmem>>, vector<1x8x32xf32>,
    return
  }
  func.func @transform_0(%arg0: i32, %arg1: i32) -> (i32, i32, i32, i32) {
    %c0_i32 = arith.constant 0 : i32
    %c0_i32_0 = arith.constant 0 : i32
    %c0_i32_1 = arith.constant 0 : i32
    return %arg0, %arg1, %c0_i32, %c0_i32_0 : i32, i32, i32, i32
  }
  func.func @transform_1(%arg0: i32, %arg1: i32) -> (i32, i32, i32) {
    %c0_i32 = arith.constant 0 : i32
    %c0_i32_0 = arith.constant 0 : i32
    %c0_i32_1 = arith.constant 0 : i32
    return %arg0, %c0_i32, %c0_i32_0 : i32, i32, i32
  }
  func.func @transform_2(%arg0: i32, %arg1: i32) -> (i32, i32, i32) {
    %c0_i32 = arith.constant 0 : i32
    %c0_i32_0 = arith.constant 0 : i32
    return %arg0, %arg1, %c0_i32 : i32, i32, i32
  }
  func.func @transform_3(%arg0: i32, %arg1: i32) -> (i32, i32) {
    %c0_i32 = arith.constant 0 : i32
    %c0_i32_0 = arith.constant 0 : i32
    %c0_i32_1 = arith.constant 0 : i32
    return %c0_i32, %c0_i32_0 : i32, i32
  }
  func.func @transform_4(%arg0: i32, %arg1: i32) -> (i32, i32) {
    %c0_i32 = arith.constant 0 : i32
    %c0_i32_0 = arith.constant 0 : i32
    %c0_i32_1 = arith.constant 0 : i32
    return %c0_i32, %c0_i32_0 : i32, i32
  }
  func.func @transform_5(%arg0: i32, %arg1: i32) -> (i32, i32, i32) {
    %c0_i32 = arith.constant 0 : i32
    %c0_i32_0 = arith.constant 0 : i32
    return %arg0, %arg1, %c0_i32 : i32, i32, i32
  }
}

</mosaic_0001>

<bundles_post_ra>
// kernel: tpu_custom_call.1
= control target key start
LH: loop header
LB: loop body
LE: loop exit
PB: predicated region body
PF: predicated region fallthrough
CT: control target
= control target key end

     0   :  { %10 = vsyncpa [#allocation3], 0  ;;  %s1052_s0 = inlined_call_operand.hbm [shape: bf16[4,8,4,32], index: 0, kind: input, shape index: {}]   ;;  %s1053_s1 = inlined_call_operand.vmem [shape: f32[4,1,32], index: 1, kind: input, shape index: {}]   ;;  %s1054_s2 = inlined_call_operand.vmem [shape: f32[4,8,1], index: 2, kind: input, shape index: {}]   ;;  %s1055_s3 = inlined_call_operand.vmem [shape: bf16[32,32], index: 3, kind: input, shape index: {}]   ;;  %s1056_s4 = inlined_call_operand.vmem [shape: f32[1,32], index: 4, kind: input, shape index: {}]   ;;  %s1057_s5 = inlined_call_operand.hbm [shape: f32[4,8,32], index: 5, kind: output, shape index: {}]  }
   0x1   :  { %12 = vsyncpa [#allocation3 + $0x1], 0 }
   0x2   :  { %13 = vsyncpa [#allocation4], 0 }
   0x3   :  { %15 = vsyncpa [#allocation4 + $0x1], 0  ;;  %s885_s18 = smov 0   ;;  %s887_s19 = smov 0  }
   0x4   :  { %s889_s20 = smov 0   ;;  %s891_s21 = smov 0  }
   0x5   :  { %s893_s22 = smov 0   ;;  %s895_s23 = smov 0  }
   0x6 LB: > { %s632_s24 = sadd.s32 4294967295, %s846_s23   ;;  %s633_s25 = sadd.s32 4294967294, %s846_s23   ;;  %s846_s23 = sphi %s895_s23, %s21_s23   ;;  %s842_s22 = sphi %s893_s22, %s1067_s22   ;;  %s838_s21 = sphi %s891_s21, %s1066_s21   ;;  %s834_s20 = sphi %s889_s20, %s1065_s20   ;;  %s830_s19 = sphi %s887_s19, %s1064_s19   ;;  %s826_s18 = sphi %s885_s18, %s1063_s18  }
   0x7   : > { %s33_s26 = sadd.s32 1, %s842_s22  ;;  %s42_s27 = sadd.s32 1, %s834_s20 }
   0x8   : > { %p35_p0 = scmp.ge.s32.totalorder %s33_s26, 4  ;;  %p49_p1 = scmp.ne.s32.totalorder %s834_s20, %s830_s19 }
   0x9   : > { %p50_p2 = scmp.eq.s32.totalorder %s846_s23, 0  ;;  %p55_p3 = scmp.ne.s32.totalorder %s830_s19, %s826_s18 }
   0xa   : > { %s1069_s26 = smov (%p35_p0, %s33_s26), 0  ;;  %p56_p5 = scmp.eq.s32.totalorder %s632_s24, 0 }
   0xb   : > { %p926_p4 = por %p50_p2, %p49_p1  ;;  %s37_s29 = ssub.s32 %s842_s22, %s1069_s26 }
   0xc   : > { %p177_p6 = scmp.eq.s32.totalorder %s632_s24, 3  ;;  %p40_p7 = scmp.eq.s32.totalorder %s37_s29, 0 }
   0xd   : > { %p932_p8 = por %p56_p5, %p55_p3  ;;  %p183_p10 = scmp.eq.s32.totalorder %s633_s25, 3 }
   0xe   : > { %p936_p9 = por %p177_p6, %p49_p1  ;;  %p676_p12 = scmp.lt.s32.totalorder %s846_s23, 4 }
   0xf   : > { %s941_s7 = scalar_select %p40_p7, %s834_s20, %s42_s27  }
  0x10   : > { %p943_p11 = por %p183_p10, %p55_p3  ;;  %s209_s9 = sand.u32 1, %s834_s20  }
  0x11   : > { %s636_s10 = sshll.u32 %s209_s9, 4  ;;  %s652_s11 = sshll.u32 %s842_s22, 8 }
  0x12   : > { %s221_s14 = scalar_lea.hbm %s1052_s0, %s652_s11  ;;  %s213_s15 = scalar_lea.vmem [#allocation2], %s636_s10 }
  0x13   : > { %s222_s16 = sshll.u32 %s213_s15, 4  ;;  %p955_p13 = pnand %p676_p12, %p926_p4  ;;  %s223_s16 = int_to_ptr.vmem [resolvable:$true] %s222_s16 }
  0x14   : > { %p639_p0 = scmp.ge.s32.totalorder %s846_s23, 1  ;;  %s210_s24 = scalar_lea.sflag [#allocation3], %s209_s9 }
  0x15   : > { %p740_p1 = pneg %p955_p13  ;;  %s751_s25 = scalar_lea.vmem %s223_s16, 256 }
  0x16   : > { %p752_p2 = scmp.ne.s32.totalorder %s223_s16, %s751_s25  ;;  %s848_s27 = smov [#allocation2]  }
  0x17   : > { %s756_s29 = sshll.u32 %s848_s27, 4  ;;  %s757_s29 = int_to_ptr.vmem [resolvable:$false] %s756_s29 }
  0x18   : > { %p754_p3 = pnand %p752_p2, %p740_p1  ;;  %s758_s10 = scalar_lea.vmem %s757_s29, 512 }
  0x19   : > { %p759_p6 = scmp.lt.s32.totalorder %s223_s16, %s757_s29  ;;  %p760_p7 = scmp.lt.s32.totalorder %s758_s10, %s751_s25 }
  0x1a   : > { %p755_p5 = pneg %p754_p3 }
  0x1b   : > { %p761_p10 = por %p760_p7, %p759_p6 }
  0x1d   : > { %p762_p4 = pnand %p761_p10, %p755_p5 }
  0x1f   : > { %765 = shalt.err (!%p762_p4)
}
  0x20   : > { %s849_s28 = smov 32   ;;  %s850_s9 = smov 2  }
  0x21   : > { %671 = dma.hbm_to_vmem [thread:$0]  (!%p955_p13), %s221_s14, 256, %s223_s16, %s210_s24, %s849_s28, %s849_s28, %s850_s9  }
  0x22   : > { %p246_p12 = scmp.lt.s32.totalorder %s846_s23, 5 }
  0x24   : > { %p247_p1 = pnand %p639_p0, %p246_p12 }
  0x25   : > { %s968_s11 = sand.u32 (!%p247_p1), 1, %s830_s19  }
  0x26   : > { %250 = sbr.rel (%p247_p1) target bundleno = 599 (0x257), region = 40  ;;  %s640_s12 = sshll.u32 (!%p247_p1), %s968_s11, 4 }
  0x27   : > { %s253_s13 = scalar_lea.sflag (!%p247_p1), [#allocation3], %s968_s11  ;;  %s256_s15 = scalar_lea.vmem (!%p247_p1), [#allocation2], %s640_s12 }
  0x2b   : > { %817 = dma.done.wait (%p932_p8), %s253_s13, 256  }
  0x2c   : > { %819 = vsyncadd (%p932_p8), %s253_s13, 4294967040  ;;  %p294_p13 = scmp.lt.s32.totalorder %s838_s21, 3  ;;  %v851_v0 = vmov 0.0   ;;  %vm852_vm0 = vmmov 0   ;;  %v853_v1 = vmov 0   ;;  %v732_v2 = vld [vmem:[%s1055_s3 + $0x8] sm:$0xff]  }
  0x2d   : > { %656 = vmatprep.subr.bf16.mxu0 %v851_v0  ;;  %660 = vmatprep.mubr.msk.bf16.mxu0 %vm852_vm0, %v851_v0  ;;  %v733_v3 = vld [vmem:[%s1055_s3] sm:$0xff]   ;;  %vm321_vm1 = vcmask 257024   ;;  %v309_v8 = vld [vmem:[%s256_s15 + $0x8] sm:$0x3]  ;;  %v310_v9 = vld [vmem:[%s256_s15 + $0xa] sm:$0x3] }
  0x2e   : > { %s978_s14 = scalar_select %p294_p13, %s838_s21, 3  ;;  %731 = vset.pattern.permute.xlu0 %v853_v1  ;;  %657 = vmatpush3.bf16.msra.mxu0 %v732_v2  ;;  %v305_v4 = vld [vmem:[%s256_s15] sm:$0x3]  ;;  %v306_v5 = vld [vmem:[%s256_s15 + $0x2] sm:$0x3]  ;;  %v317_v16 = vunpack.c.l.bf16 %v309_v8  ;;  %v318_v17 = vunpack.c.l.bf16 %v310_v9  ;;  %vm414_vm2 = vcmask 1041409  }
  0x2f   : > { %v307_v6 = vld [vmem:[%s256_s15 + $0x4] sm:$0x3]  ;;  %658 = vmatprep.subr.bf16.mxu0 %v851_v0  ;;  %v308_v7 = vld [vmem:[%s256_s15 + $0x6] sm:$0x3]  ;;  %v313_v10 = vunpack.c.l.bf16 %v305_v4  ;;  %v314_v11 = vunpack.c.l.bf16 %v306_v5  ;;  %v311_v13 = vld [vmem:[%s256_s15 + $0xc] sm:$0x3] }
  0x30   : > { %s642_s16 = sshll.u32 %s978_s14, 3  ;;  %v315_v12 = vunpack.c.l.bf16 %v307_v6  ;;  %v312_v14 = vld [vmem:[%s256_s15 + $0xe] sm:$0x3]  ;;  %v316_v15 = vunpack.c.l.bf16 %v308_v7  ;;  %v319_v19 = vunpack.c.l.bf16 %v311_v13  ;;  %v350_v29 = vsel %vm321_vm1, %v317_v16, 0.0  ;;  %s296_s12 = scalar_lea.vmem %s1053_s1, %s978_s14 }
  0x31   : > { %s303_s10 = scalar_lea.vmem %s1054_s2, %s642_s16  ;;  %v320_v20 = vunpack.c.l.bf16 %v312_v14  ;;  %v322_v21 = vsel %vm321_vm1, %v313_v10, 0.0  ;;  %v329_v22 = vsel %vm321_vm1, %v314_v11, 0.0  ;;  %v357_v30 = vsel %vm321_vm1, %v318_v17, 0.0  ;;  %s641_s14 = sshll.u32 %s968_s11, 3 }
  0x32   : > { %v390_v18 = vld [vmem:[%s303_s10] sm:$0xff]  ;;  %659 = vmatpush3.bf16.msra.mxu0 %v733_v3  ;;  %v323_v23 = vrot.slane %v322_v21, 4  ;;  %v330_v24 = vrot.slane %v329_v22, 4  ;;  %v336_v25 = vsel %vm321_vm1, %v315_v12, 0.0  ;;  %v343_v26 = vsel %vm321_vm1, %v316_v15, 0.0  ;;  %s649_s16 = sshll.u32 %s838_s21, 7 }
  0x33   : > { %487 = vperm.xlu0 %731, %v390_v18   ;;  %v337_v27 = vrot.slane %v336_v25, 4  ;;  %v344_v28 = vrot.slane %v343_v26, 4  ;;  %v351_v33 = vrot.slane %v350_v29, 4  ;;  %v358_v34 = vrot.slane %v357_v30, 4  ;;  %s292_s17 = scalar_lea.vmem [#allocation5], %s641_s14  ;;  %s524_s27 = scalar_lea.hbm %s1057_s5, %s649_s16 }
  0x34   : > { %v324_v31 = vadd.f32 %v323_v23, %v322_v21  ;;  %v331_v32 = vadd.f32 %v330_v24, %v329_v22  ;;  %v364_v37 = vsel %vm321_vm1, %v319_v19, 0.0  ;;  %v371_v38 = vsel %vm321_vm1, %v320_v20, 0.0  ;;  %s526_s24 = sshll.u32 %s292_s17, 4  ;;  %s512_s29 = scalar_lea.sflag [#allocation4], %s968_s11  ;;  %s527_s24 = int_to_ptr.vmem [resolvable:$true] %s526_s24 }
  0x35   : > { %v338_v35 = vadd.f32 %v337_v27, %v336_v25  ;;  %v345_v36 = vadd.f32 %v344_v28, %v343_v26  ;;  %v352_v41 = vadd.f32 %v351_v33, %v350_v29  ;;  %v359_v42 = vadd.f32 %v358_v34, %v357_v30  ;;  %s766_s10 = scalar_lea.vmem %s527_s24, 128  ;;  %s854_s28 = smov [#allocation5]  }
  0x36   : > { %v325_v39 = vrot.slane %v324_v31, 2  ;;  %v332_v40 = vrot.slane %v331_v32, 2  ;;  %v365_v45 = vrot.slane %v364_v37, 4  ;;  %v372_v46 = vrot.slane %v371_v38, 4  ;;  %p767_p8 = scmp.ne.s32.totalorder %s527_s24, %s766_s10  ;;  %s770_s9 = sshll.u32 %s854_s28, 4  ;;  %s771_s9 = int_to_ptr.vmem [resolvable:$false] %s770_s9 }
  0x37   : > { %v339_v43 = vrot.slane %v338_v35, 2  ;;  %v346_v44 = vrot.slane %v345_v36, 2  ;;  %v353_v49 = vrot.slane %v352_v41, 2  ;;  %v360_v50 = vrot.slane %v359_v42, 2  ;;  %s772_s21 = scalar_lea.vmem %s771_s9, 256  ;;  %p773_p3 = scmp.lt.s32.totalorder %s527_s24, %s771_s9 }
  0x38   : > { %v326_v47 = vadd.f32 %v325_v39, %v324_v31  ;;  %v333_v48 = vadd.f32 %v332_v40, %v331_v32  ;;  %vm416_vm3 = vcmask 1042434   ;;  %v366_v53 = vadd.f32 %v365_v45, %v364_v37  ;;  %v643_v37 = vld [vmem:[%s296_s12] ss:$0 sm:$0xff]  ;;  %p768_p0 = pnand %p767_p8, %p936_p9  ;;  %p774_p5 = scmp.lt.s32.totalorder %s772_s21, %s766_s10 }
  0x39   : > { %v340_v51 = vadd.f32 %v339_v43, %v338_v35  ;;  %v347_v52 = vadd.f32 %v346_v44, %v345_v36  ;;  %v373_v54 = vadd.f32 %v372_v46, %v371_v38  ;;  %vm418_vm4 = vcmask 1043459  }
  0x3a   : > { %v327_v55 = vrot.slane %v326_v47, 1  ;;  %v334_v56 = vrot.slane %v333_v48, 1  ;;  %v354_v57 = vadd.f32 %v353_v49, %v352_v41  ;;  %v361_v58 = vadd.f32 %v360_v50, %v359_v42  ;;  %v647_v42 = vld [vmem:[%s1056_s4] ss:$0 sm:$0xff]  ;;  %p769_p2 = pneg %p768_p0  ;;  %p775_p6 = por %p774_p5, %p773_p3 }
  0x3b   : > { %v341_v59 = vrot.slane %v340_v51, 1  ;;  %v348_v60 = vrot.slane %v347_v52, 1  ;;  %v367_v61 = vrot.slane %v366_v53, 2  ;;  %v374_v62 = vrot.slane %v373_v54, 2 }
  0x3c   : > { %v328_v63 = vadd.f32 %v327_v55, %v326_v47  ;;  %v335_v0 = vadd.f32 %v334_v56, %v333_v48  ;;  %v355_v1 = vrot.slane %v354_v57, 1  ;;  %v362_v2 = vrot.slane %v361_v58, 1  ;;  %p776_p7 = pnand %p775_p6, %p769_p2 }
  0x3d   : > { %v342_v3 = vadd.f32 %v341_v59, %v340_v51  ;;  %v349_v4 = vadd.f32 %v348_v60, %v347_v52  ;;  %v368_v5 = vadd.f32 %v367_v61, %v366_v53  ;;  %v375_v6 = vadd.f32 %v374_v62, %v373_v54 }
  0x3e   : > { %v356_v7 = vadd.f32 %v355_v1, %v354_v57  ;;  %v363_v8 = vadd.f32 %v362_v2, %v361_v58  ;;  %v378_v9 = vpack.c.bf16 %v328_v63, %v328_v63  ;;  %v379_v10 = vpack.c.bf16 %v335_v0, %v335_v0 }
  0x3f   : > { %v369_v11 = vrot.slane %v368_v5, 1  ;;  %v376_v12 = vrot.slane %v375_v6, 1  ;;  %v380_v13 = vpack.c.bf16 %v342_v3, %v342_v3  ;;  %v381_v14 = vpack.c.bf16 %v349_v4, %v349_v4 }
  0x40   : > { %v382_v15 = vpack.c.bf16 %v356_v7, %v356_v7  ;;  %v383_v16 = vpack.c.bf16 %v363_v8, %v363_v8  ;;  %v406_v17 = vunpack.c.l.b16 %v378_v9  ;;  %v407_v18 = vunpack.c.l.b16 %v379_v10 }
  0x41   : > { %v370_v19 = vadd.f32 %v369_v11, %v368_v5  ;;  %v377_v20 = vadd.f32 %v376_v12, %v375_v6  ;;  %v408_v21 = vunpack.c.l.b16 %v380_v13  ;;  %v409_v22 = vunpack.c.l.b16 %v381_v14 }
  0x42   : > { %v410_v23 = vunpack.c.l.b16 %v382_v15  ;;  %v411_v24 = vunpack.c.l.b16 %v383_v16  ;;  %v415_v25 = vsel %vm414_vm2, %v407_v18, %v406_v17  ;;  %vm420_vm5 = vcmask 1044484  }
  0x43   : > { %v384_v26 = vpack.c.bf16 %v370_v19, %v370_v19  ;;  %v385_v27 = vpack.c.bf16 %v377_v20, %v377_v20  ;;  %v417_v28 = vsel %vm416_vm3, %v408_v21, %v415_v25  ;;  %vm422_vm6 = vcmask 1045509  }
  0x44   : > { %v419_v29 = vsel %vm418_vm4, %v409_v22, %v417_v28  ;;  %vm424_vm7 = vcmask 1046534   ;;  %vm426_vm8 = vcmask 1047559   ;;  %vm441_vm9 = vcmask 261120  }
  0x45   : > { %v412_v30 = vunpack.c.l.b16 %v384_v26  ;;  %v413_v31 = vunpack.c.l.b16 %v385_v27  ;;  %v421_v32 = vsel %vm420_vm5, %v410_v23, %v419_v29 }
  0x46   : > { %v423_v33 = vsel %vm422_vm6, %v411_v24, %v421_v32 }
  0x47   : > { %v425_v34 = vsel %vm424_vm7, %v412_v30, %v423_v33 }
  0x48   : > { %v427_v35 = vsel %vm426_vm8, %v413_v31, %v425_v34 }
  0x49   : > { %v428_v36 = vpack.c.b16 %v427_v35, %v427_v35 }
  0x4b   : > { %661 = vmatmul.mubr.msk.bf16.vlgmr.msra.gmra.mxu0 %vm441_vm9, %v428_v36 }
  0xae   : > { %v488_v39 = vpop.permute.xlu0 %487 }
 0x10b   : > { %v479_v38 = vpop.f32.mrf.mxu0 }
 0x10c   : > { %v480_v40 = vadd.f32 %v643_v37, %v479_v38 }
 0x10d   : > { %v662_v41 = vpop.f32.mrf.mxu0 }
 0x10e   : > { %v490_v43 = vmul.f32 %v488_v39, %v480_v40 }
 0x10f   : > { %v482_v44 = vpop.f32.mrf.mxu0 }
 0x110   : > { %v498_v45 = vadd.f32 %v647_v42, %v490_v43 }
 0x111   : > { %v663_v46 = vpop.f32.mrf.mxu0 }
 0x112   : > { %v499_v47 = vsel %vm441_vm9, %v498_v45, -inf }
 0x113   : > { %500 = vmax.xlane.f32.xlu0 %v499_v47 }
 0x19c   : > { %v501_v48 = vpop.xlane.xlu0 %500 }
 0x19d   : > { %v502_v49 = vsub.f32 %v498_v45, %v501_v48 }
 0x19f   : > { %v503_v50 = vmul.f32 1.442695, %v502_v49 }
 0x1a1   : > { %734 = vpow2.f32 %v503_v50 }
 0x1ae   : > { %v735_v51 = vpop.eup %734 }
 0x1af   : > { %v505_v52 = vsel %vm441_vm9, %v735_v51, 0.0 }
 0x1b0   : > { %506 = vadd.xlane.f32.xlu1 %v505_v52 }
 0x239   : > { %v507_v53 = vpop.xlane.xlu1 %506 }
 0x23a   : > { %736 = vrcp.f32 %v507_v53 }
 0x247   : > { %v737_v54 = vpop.eup %736 }
 0x248   : > { %v509_v55 = vmul.f32 %v737_v54, %v735_v51 }
 0x24a   : > { %510 = vst.msk [vmem:[%s292_s17] sm:$0xff] %vm441_vm9, %v509_v55 }
 0x24b   : > { %779 = shalt.err (!%p776_p7)
}
 0x24c   : > { %s780_s12 = scalar_lea.hbm %s524_s27, 128  ;;  %s784_s15 = scalar_lea.hbm %s1057_s5, 512 }
 0x24d   : > { %p781_p10 = scmp.ne.s32.totalorder %s524_s27, %s780_s12  ;;  %p785_p1 = scmp.lt.s32.totalorder %s524_s27, %s1057_s5 }
 0x24e   : > { %p786_p13 = scmp.lt.s32.totalorder %s784_s15, %s780_s12 }
 0x24f   : > { %p782_p4 = pnand %p781_p10, %p936_p9 }
 0x250   : > { %p787_p8 = por %p786_p13, %p785_p1 }
 0x251   : > { %p783_p12 = pneg %p782_p4 }
 0x253   : > { %p788_p0 = pnand %p787_p8, %p783_p12 }
 0x255   : > { %791 = shalt.err (!%p788_p0)
}
 0x256   : > { %666 = dma.vmem_to_hbm [thread:$0]  (%p936_p9), %s527_s24, 128, %s524_s27, %s512_s29  }
 0x257 PF: > { %p677_p2 = scmp.ge.s32.totalorder %s846_s23, 2  ;;  %s538_s17 = sand.u32 1, %s826_s18  }
 0x258   : > { %s539_s25 = scalar_lea.sflag [#allocation4], %s538_s17 }
 0x259   : > { %p673_p3 = pnand %p677_p2, %p943_p11 }
 0x25b   : > { %p674_p5 = pneg %p673_p3 }
 0x25d   : > { %821 = dma.done.wait (%p674_p5), %s539_s25, 128  }
 0x25e   : > { %823 = vsyncadd (%p674_p5), %s539_s25, 4294967168  ;;  %s21_s23 = sadd.s32 1, %s846_s23   ;;  %s1063_s18 = smov %s830_s19 }
 0x25f   : > { %p18_p6 = scmp.ge.s32.totalorder %s21_s23, 6   ;;  %s1064_s19 = smov %s834_s20 }
 0x260   : > { %s1065_s20 = smov %s941_s7  ;;  %s1066_s21 = smov %s842_s22 }
 0x261   : > { %s1067_s22 = smov %s1069_s26  ;;  %20 = sbr.rel (!%p18_p6) target bundleno = 6 (0x6), region = 91 }
 0x266   :  { %544 = vsyncpa [#allocation3], 1 }
 0x267   :  { %546 = vsyncpa [#allocation3 + $0x1], 1 }
 0x268   :  { %547 = vsyncpa [#allocation4], 1 }
 0x269   :  { %549 = vsyncpa [#allocation4 + $0x1], 1 }

</bundles_post_ra>
